<compile_context>
chip_gen: v7x
topology: tpu7x:2x2x1
jax: 0.10.0
libtpu: 0.0.40
codegen_flags: <defaults>
</compile_context>

<pallas_src>
import functools

import numpy as np

import jax
import jax.numpy as jnp
from jax.experimental import pallas as pl
from jax.experimental.pallas import tpu as pltpu


# ----------------------------------------------------------------------------
# Fused kernel: conv(3x3, VALID) + bias + ReLU + masked avg-pool + all heads
# ----------------------------------------------------------------------------
def _fused_mas_kernel(panel_ref, wf_ref, cb_ref, pm_ref, hw_ref, hb_ref,
                      out_ref):
    # panel_ref: (L_pad, K)  bf16 im2col panel (K = kh*kw*Cin), pad rows zero
    # wf_ref   : (K, F)      bf16 flattened conv weight
    # cb_ref   : (1, F)      f32  conv bias
    # pm_ref   : (N, L_pad)  f32  pooling/mask matrix (1/(Ho*Wo) at valid pos)
    # hw_ref   : (F, 128)    bf16 concatenated + zero-padded head weights
    # hb_ref   : (1, 128)    f32  concatenated + zero-padded head biases
    # out_ref  : (N, 128)    f32  padded logits (lane-dense store)

    # Conv as ONE MXU matmul; K accumulates inside the MXU (no per-tap RMW).
    act = jnp.dot(panel_ref[...], wf_ref[...],
                  preferred_element_type=jnp.float32)         # (L_pad, F) f32
    act = jnp.maximum(act + cb_ref[...], 0.0)                 # bias + ReLU, f32

    # Global average pool on the MXU; the pooling matrix masks the pad rows,
    # separates batch elements and applies the 1/(Ho*Wo) scale.
    feats = jnp.dot(pm_ref[...], act,
                    preferred_element_type=jnp.float32)       # (N, F) f32

    # All heads fused into one padded matmul -> lane-dense (N, 128) store.
    logits = jnp.dot(feats.astype(hw_ref.dtype), hw_ref[...],
                     preferred_element_type=jnp.float32) + hb_ref[...]
    out_ref[...] = logits.astype(out_ref.dtype)


# ----------------------------------------------------------------------------
# Jitted wrapper: im2col layout prep + pallas_call + head split
# ----------------------------------------------------------------------------
@functools.partial(jax.jit, static_argnames=("kh", "kw", "head_slices"))
def _mas_forward(x, conv_w_flat, conv_b_row, pool_mat, heads_w_pad,
                 heads_b_pad, *, kh, kw, head_slices):
    n, c_in, h, w = x.shape
    ho, wo = h - kh + 1, w - kw + 1
    l = n * ho * wo
    l_pad = pool_mat.shape[1]
    k_dim = kh * kw * c_in
    f = conv_w_flat.shape[-1]
    t_pad = heads_w_pad.shape[-1]

    # Host-side im2col (layout plumbing only, ~36 KB in bf16), tap-major then
    # channel, matching the (kh, kw, Cin, F) -> (K, F) weight reshape.
    x_nhwc = jnp.transpose(x, (0, 2, 3, 1))                  # (N, H, W, Cin)
    taps = [x_nhwc[:, ki:ki + ho, kj:kj + wo, :]
            for ki in range(kh) for kj in range(kw)]         # each (N,Ho,Wo,Cin)
    panel = jnp.stack(taps, axis=3).reshape(l, k_dim)        # (L, K)
    panel = jnp.pad(panel, ((0, l_pad - l), (0, 0)))         # zero (finite) pad
    panel = panel.astype(jnp.bfloat16)

    logits = pl.pallas_call(
        _fused_mas_kernel,
        out_shape=jax.ShapeDtypeStruct((n, t_pad), jnp.float32),
        grid=(1,),
        in_specs=[
            pl.BlockSpec((l_pad, k_dim), lambda i: (0, 0)),
            pl.BlockSpec((k_dim, f), lambda i: (0, 0)),
            pl.BlockSpec((1, f), lambda i: (0, 0)),
            pl.BlockSpec((n, l_pad), lambda i: (0, 0)),
            pl.BlockSpec((f, t_pad), lambda i: (0, 0)),
            pl.BlockSpec((1, t_pad), lambda i: (0, 0)),
        ],
        out_specs=pl.BlockSpec((n, t_pad), lambda i: (0, 0)),
        compiler_params=pltpu.CompilerParams(
            dimension_semantics=("arbitrary",)),
    )(panel, conv_w_flat, conv_b_row, pool_mat, heads_w_pad, heads_b_pad)

    # Split the padded fused logits back into the per-node dict (tiny slices).
    return {code: logits[:, off:off + cnt] for code, off, cnt in head_slices}


class MASModelPallas:
    """Pallas re-implementation of MASModel.forward (fused single kernel)."""

    def __init__(self, c_in=4, feature_num=32, kh=3, kw=3,
                 children_counts=None, seed=0):
        if children_counts is None:
            # hierarchy['inners_code_list'] -> children count per inner node
            children_counts = {0: 3, 1: 2, 2: 4, 3: 1}
        self.c_in, self.feature_num, self.kh, self.kw = c_in, feature_num, kh, kw
        self.children_counts = children_counts
        # heads only for nodes with more than one child (matches reference)
        self.heads_index = [c for c, cnt in children_counts.items() if cnt > 1]

        key = jax.random.PRNGKey(seed)
        k_cw, k_cb, key = jax.random.split(key, 3)

        # backbone conv params, PyTorch layout (Cout, Cin, kh, kw), f32 master
        self.conv_w = jax.random.normal(
            k_cw, (feature_num, c_in, kh, kw), jnp.float32) * 0.05
        self.conv_b = jax.random.normal(
            k_cb, (feature_num,), jnp.float32) * 0.05

        # per-head Linear params: W (children, F), b (children,)
        head_ws, head_bs, slices = [], [], []
        off = 0
        for code in self.heads_index:
            cnt = children_counts[code]
            kw_, kb_, key = jax.random.split(key, 3)
            head_ws.append(
                jax.random.normal(kw_, (cnt, feature_num), jnp.float32) * 0.1)
            head_bs.append(jax.random.normal(kb_, (cnt,), jnp.float32) * 0.1)
            slices.append((code, off, cnt))
            off += cnt
        self.total_head_out = off
        self.head_slices = tuple(slices)

        # Concatenated heads (f32 masters, used by the pure-JAX reference) ...
        self.heads_w = jnp.concatenate(head_ws, axis=0).T          # (F, T)
        self.heads_b = jnp.concatenate(head_bs, axis=0)[None, :]   # (1, T)
        # ... zero-padded to 128 columns (lane-dense store); weights in bf16.
        t_pad = max(128, ((off + 127) // 128) * 128)
        self.heads_w_pad = jnp.zeros(
            (feature_num, t_pad), jnp.float32).at[:, :off].set(
                self.heads_w).astype(jnp.bfloat16)
        self.heads_b_pad = jnp.zeros(
            (1, t_pad), jnp.float32).at[:, :off].set(self.heads_b)

        # Conv weight flattened once to (kh*kw*Cin, F), tap-major then channel
        # (matches the im2col panel column order), bf16 for the MXU.
        self.conv_w_flat = jnp.transpose(
            self.conv_w, (2, 3, 1, 0)).reshape(
                kh * kw * c_in, feature_num).astype(jnp.bfloat16)
        self.conv_b_row = self.conv_b[None, :]                     # f32

        # Pooling matrices depend only on static input shapes -> cache them.
        self._pool_cache = {}

    def _pool_mat(self, n, h, w):
        key = (n, h, w)
        if key not in self._pool_cache:
            ho, wo = h - self.kh + 1, w - self.kw + 1
            l = n * ho * wo
            l_pad = max(128, ((l + 127) // 128) * 128)   # (8,128)-aligned rows
            pm = np.zeros((n, l_pad), np.float32)
            inv = 1.0 / float(ho * wo)
            for b in range(n):
                pm[b, b * ho * wo:(b + 1) * ho * wo] = inv
            self._pool_cache[key] = jnp.asarray(pm)
        return self._pool_cache[key]

    def __call__(self, x):
        # x: (N, Cin, H, W) NCHW, float32
        n, _, h, w = x.shape
        pool_mat = self._pool_mat(n, h, w)
        return _mas_forward(x, self.conv_w_flat, self.conv_b_row, pool_mat,
                            self.heads_w_pad, self.heads_b_pad,
                            kh=self.kh, kw=self.kw,
                            head_slices=self.head_slices)


if __name__ == "__main__":
    key = jax.random.PRNGKey(0)
    x = jax.random.normal(key, (2, 4, 16, 16), jnp.float32)   # NCHW input

    model = MASModelPallas(c_in=4, feature_num=32, seed=0)
    outputs = model(x)
    jax.block_until_ready(outputs)

    # Sanity check against a pure-JAX f32 reference of the same math
    # (kernel matmul inputs are bf16 -> relaxed tolerance).
    def ref(x):
        out = jax.lax.conv_general_dilated(
            x, model.conv_w, (1, 1), "VALID",
            dimension_numbers=("NCHW", "OIHW", "NCHW"))
        out = jax.nn.relu(out + model.conv_b[None, :, None, None])
        feats = out.mean(axis=(2, 3))                         # (N, F)
        logits = feats @ model.heads_w + model.heads_b        # (N, T)
        return {code: logits[:, off:off + cnt]
                for code, off, cnt in model.head_slices}

    ref_out = ref(x)
    for code, _, _ in model.head_slices:
        assert outputs[code].shape == ref_out[code].shape
        assert jnp.allclose(outputs[code], ref_out[code], atol=2e-2, rtol=2e-2)

    print("KERNEL_OK")
</pallas_src>

<mosaic_0001>
module attributes {stable_mosaic.version = 11 : i64} {
  func.func @_fused_mas_kernel(%arg0: i32, %arg1: memref<512x36xbf16, #tpu.memory_space<vmem>>, %arg2: memref<36x32xbf16, #tpu.memory_space<vmem>>, %arg3: memref<1x32xf32, #tpu.memory_space<vmem>>, %arg4: memref<2x512xf32, #tpu.memory_space<vmem>>, %arg5: memref<32x128xbf16, #tpu.memory_space<vmem>>, %arg6: memref<1x128xf32, #tpu.memory_space<vmem>>, %arg7: memref<2x128xf32, #tpu.memory_space<vmem>>) attributes {dimension_semantics = [#tpu.dimension_semantics<arbitrary>], iteration_bounds = array<i64: 1>, scalar_prefetch = 0 : i64, scratch_operands = 0 : i64, tpu.core_type = #tpu.core_type<tc>, window_params = [{pipeline_mode = #tpu.pipeline_mode<synchronous>, transform_indices = @transform_0, window_bounds = array<i64: 512, 36>}, {pipeline_mode = #tpu.pipeline_mode<synchronous>, transform_indices = @transform_1, window_bounds = array<i64: 36, 32>}, {pipeline_mode = #tpu.pipeline_mode<synchronous>, transform_indices = @transform_2, window_bounds = array<i64: 1, 32>}, {pipeline_mode = #tpu.pipeline_mode<synchronous>, transform_indices = @transform_3, window_bounds = array<i64: 2, 512>}, {pipeline_mode = #tpu.pipeline_mode<synchronous>, transform_indices = @transform_4, window_bounds = array<i64: 32, 128>}, {pipeline_mode = #tpu.pipeline_mode<synchronous>, transform_indices = @transform_5, window_bounds = array<i64: 1, 128>}, {pipeline_mode = #tpu.pipeline_mode<synchronous>, transform_indices = @transform_6, window_bounds = array<i64: 2, 128>}]} {
    %c0 = arith.constant 0 : index
    %c0_0 = arith.constant 0 : index
    %0 = vector.load %arg1[%c0, %c0_0] : memref<512x36xbf16, #tpu.memory_space<vmem>>, vector<512x36xbf16>
    %c0_1 = arith.constant 0 : index
    %c0_2 = arith.constant 0 : index
    %1 = vector.load %arg2[%c0_1, %c0_2] : memref<36x32xbf16, #tpu.memory_space<vmem>>, vector<36x32xbf16>
    %cst = arith.constant dense<0.000000e+00> : vector<512x32xf32>
    %2 = tpu.matmul %0, %1, %cst {dimension_numbers = #tpu.dot_dimension_numbers<[1], [0], [0], [1], [0, 0, 1, 1], [], []>} : vector<512x36xbf16>, vector<36x32xbf16>, vector<512x32xf32> -> vector<512x32xf32>
    %c0_3 = arith.constant 0 : index
    %c0_4 = arith.constant 0 : index
    %3 = vector.load %arg3[%c0_3, %c0_4] : memref<1x32xf32, #tpu.memory_space<vmem>>, vector<1x32xf32>
    %4 = vector.broadcast %3 : vector<1x32xf32> to vector<512x32xf32>
    %5 = arith.addf %2, %4 : vector<512x32xf32>
    %cst_5 = arith.constant 0.000000e+00 : f32
    %6 = vector.broadcast %cst_5 : f32 to vector<512x32xf32>
    %7 = arith.maximumf %5, %6 : vector<512x32xf32>
    %c0_6 = arith.constant 0 : index
    %c0_7 = arith.constant 0 : index
    %8 = vector.load %arg4[%c0_6, %c0_7] : memref<2x512xf32, #tpu.memory_space<vmem>>, vector<2x512xf32>
    %cst_8 = arith.constant dense<0.000000e+00> : vector<2x32xf32>
    %9 = tpu.matmul %8, %7, %cst_8 {dimension_numbers = #tpu.dot_dimension_numbers<[1], [0], [0], [1], [0, 0, 1, 1], [], []>} : vector<2x512xf32>, vector<512x32xf32>, vector<2x32xf32> -> vector<2x32xf32>
    %10 = arith.truncf %9 : vector<2x32xf32> to vector<2x32xbf16>
    %c0_9 = arith.constant 0 : index
    %c0_10 = arith.constant 0 : index
    %11 = vector.load %arg5[%c0_9, %c0_10] : memref<32x128xbf16, #tpu.memory_space<vmem>>, vector<32x128xbf16>
    %cst_11 = arith.constant dense<0.000000e+00> : vector<2x128xf32>
    %12 = tpu.matmul %10, %11, %cst_11 {dimension_numbers = #tpu.dot_dimension_numbers<[1], [0], [0], [1], [0, 0, 1, 1], [], []>} : vector<2x32xbf16>, vector<32x128xbf16>, vector<2x128xf32> -> vector<2x128xf32>
    %c0_12 = arith.constant 0 : index
    %c0_13 = arith.constant 0 : index
    %13 = vector.load %arg6[%c0_12, %c0_13] : memref<1x128xf32, #tpu.memory_space<vmem>>, vector<1x128xf32>
    %14 = vector.broadcast %13 : vector<1x128xf32> to vector<2x128xf32>
    %15 = arith.addf %12, %14 : vector<2x128xf32>
    %c0_14 = arith.constant 0 : index
    %c0_15 = arith.constant 0 : index
    %16 = vector.load %arg7[%c0_14, %c0_15] : memref<2x128xf32, #tpu.memory_space<vmem>>, vector<2x128xf32>
    tpu.vector_store %arg7[%c0_14, %c0_15], %15 {strides = array<i32>} : memref<2x128xf32, #tpu.memory_space<vmem>>, vector<2x128xf32>,
    return
  }
  func.func @transform_0(%arg0: i32) -> (i32, i32) {
    %c0_i32 = arith.constant 0 : i32
    %c0_i32_0 = arith.constant 0 : i32
    %c0_i32_1 = arith.constant 0 : i32
    return %c0_i32, %c0_i32_0 : i32, i32
  }
  func.func @transform_1(%arg0: i32) -> (i32, i32) {
    %c0_i32 = arith.constant 0 : i32
    %c0_i32_0 = arith.constant 0 : i32
    %c0_i32_1 = arith.constant 0 : i32
    return %c0_i32, %c0_i32_0 : i32, i32
  }
  func.func @transform_2(%arg0: i32) -> (i32, i32) {
    %c0_i32 = arith.constant 0 : i32
    %c0_i32_0 = arith.constant 0 : i32
    %c0_i32_1 = arith.constant 0 : i32
    return %c0_i32, %c0_i32_0 : i32, i32
  }
  func.func @transform_3(%arg0: i32) -> (i32, i32) {
    %c0_i32 = arith.constant 0 : i32
    %c0_i32_0 = arith.constant 0 : i32
    %c0_i32_1 = arith.constant 0 : i32
    return %c0_i32, %c0_i32_0 : i32, i32
  }
  func.func @transform_4(%arg0: i32) -> (i32, i32) {
    %c0_i32 = arith.constant 0 : i32
    %c0_i32_0 = arith.constant 0 : i32
    %c0_i32_1 = arith.constant 0 : i32
    return %c0_i32, %c0_i32_0 : i32, i32
  }
  func.func @transform_5(%arg0: i32) -> (i32, i32) {
    %c0_i32 = arith.constant 0 : i32
    %c0_i32_0 = arith.constant 0 : i32
    %c0_i32_1 = arith.constant 0 : i32
    return %c0_i32, %c0_i32_0 : i32, i32
  }
  func.func @transform_6(%arg0: i32) -> (i32, i32) {
    %c0_i32 = arith.constant 0 : i32
    %c0_i32_0 = arith.constant 0 : i32
    %c0_i32_1 = arith.constant 0 : i32
    return %c0_i32, %c0_i32_0 : i32, i32
  }
}

</mosaic_0001>

<bundles_post_ra>
// kernel: _mas_forward.1
= control target key start
LH: loop header
LB: loop body
LE: loop exit
PB: predicated region body
PF: predicated region fallthrough
CT: control target
= control target key end

     0   :  { %vm275_vm0 = vcmask 293888   ;;  %vm372_vm1 = vcmask 1041408   ;;  %v1336_v36 = vmov 1983009808   ;;  %v735_v38 = vlaneseq  ;;  %s1659_s1 = inlined_call_operand.vmem [shape: bf16[36,32], index: 1, kind: input, shape index: {}]   ;;  %s1660_s0 = inlined_call_operand.vmem [shape: bf16[512,36], index: 0, kind: input, shape index: {}]   ;;  %s1661_s3 = inlined_call_operand.vmem [shape: f32[2,512], index: 3, kind: input, shape index: {}]   ;;  %s1662_s2 = inlined_call_operand.vmem [shape: f32[1,32], index: 2, kind: input, shape index: {}]   ;;  %s1663_s4 = inlined_call_operand.vmem [shape: bf16[32,128], index: 4, kind: input, shape index: {}]   ;;  %s1664_s5 = inlined_call_operand.vmem [shape: f32[1,128], index: 5, kind: input, shape index: {}]   ;;  %s1665_s6 = inlined_call_operand.vmem [shape: f32[2,128], index: 6, kind: output, shape index: {}]  }
   0x1   :  { %v1298_v0 = vld [vmem:[%s1659_s1] sm:$0xff]   ;;  %v1299_v1 = vld [vmem:[%s1659_s1 + $0x8] sm:$0xff]   ;;  %v1300_v2 = vld [vmem:[%s1659_s1 + $0x10] ss:$0 sps:$4 sm:$0x33]   ;;  %v733_v37 = vunpack.c.l.s4 %v1336_v36  ;;  %vm1338_vm2 = vmmov 0  }
   0x2   :  { %1145 = vmatprep.subr.bf16.mxu0 %v1298_v0  ;;  %v1301_v3 = vld [vmem:[%s1660_s0] sm:$0xff]   ;;  %1287 = vmatprep.subr.bf16.mxu1 %v1298_v0  ;;  %v374_v4 = vsel %vm372_vm1, %v1300_v2, 0  ;;  %v1302_v5 = vld [vmem:[%s1660_s0 + $0x8] sm:$0xff]   ;;  %v1303_v6 = vld [vmem:[%s1660_s0 + $0x10] sm:$0xff]   ;;  %v736_v40 = vshrl.u32 %v735_v38, 7  ;;  %vm916_vm3 = vcmask 261120  }
   0x3   :  { %1146 = vmatpush3.bf16.msra.mxu0 %v1298_v0  ;;  %1290 = vmatpush3.bf16.msra.mxu1 %v1298_v0  ;;  %v1304_v7 = vld [vmem:[%s1660_s0 + $0x18] sm:$0xff]   ;;  %v1316_v8 = vld [vmem:[%s1660_s0 + $0xb0] sm:$0xff]   ;;  %v1305_v9 = vld [vmem:[%s1660_s0 + $0x20] sm:$0xff]   ;;  %v734_v39 = vunpack.c.0.s8 %v733_v37 }
   0x4   :  { %1147 = vmatprep.subr.bf16.mxu0 %v1299_v1  ;;  %1151 = vmatprep.mubr.msk.bf16.mxu0 %vm275_vm0, %v1301_v3  ;;  %v1318_v10 = vld [vmem:[%s1660_s0 + $0xb8] sm:$0xff]   ;;  %v1319_v11 = vld [vmem:[%s1660_s0 + $0xc0] sm:$0xff]   ;;  %v1306_v12 = vld [vmem:[%s1660_s0 + $0x28] sm:$0xff]  }
   0x5   :  { %1288 = vmatprep.subr.bf16.mxu1 %v1299_v1  ;;  %1195 = vmatprep.mubr.msk.bf16.mxu1 %vm275_vm0, %v1316_v8  ;;  %v1307_v13 = vld [vmem:[%s1660_s0 + $0x30] sm:$0xff]   ;;  %v1321_v14 = vld [vmem:[%s1660_s0 + $0xc8] sm:$0xff]   ;;  %v1308_v16 = vld [vmem:[%s1660_s0 + $0x38] sm:$0xff]   ;;  %v737_v41 = vsub.s32 %v734_v39, %v736_v40 }
   0x6   :  { %v1323_v15 = vld [vmem:[%s1660_s0 + $0xd0] sm:$0xff]   ;;  %v1325_v17 = vld [vmem:[%s1660_s0 + $0xd8] sm:$0xff]   ;;  %v1309_v18 = vld [vmem:[%s1660_s0 + $0x40] sm:$0xff]  }
   0x7   :  { %1148 = vmatpush3.bf16.msra.mxu0 %v1299_v1  ;;  %1291 = vmatpush3.bf16.msra.mxu1 %v1299_v1  ;;  %v1327_v19 = vld [vmem:[%s1660_s0 + $0xe0] sm:$0xff]   ;;  %v1310_v20 = vld [vmem:[%s1660_s0 + $0x48] sm:$0xff]   ;;  %v1311_v22 = vld [vmem:[%s1660_s0 + $0x50] sm:$0xff]  }
   0x8   :  { %1293 = vmatprep.subr.msk.bf16.mxu0 %vm372_vm1, %v1300_v2  ;;  %1294 = vmatprep.subr.msk.bf16.mxu1 %vm372_vm1, %v1300_v2  ;;  %v1329_v21 = vld [vmem:[%s1660_s0 + $0xe8] sm:$0xff]   ;;  %v1331_v23 = vld [vmem:[%s1660_s0 + $0xf0] sm:$0xff]   ;;  %v1312_v24 = vld [vmem:[%s1660_s0 + $0x58] sm:$0xff]  }
   0x9   :  { %v1332_v25 = vld [vmem:[%s1660_s0 + $0xf8] sm:$0xff]   ;;  %v1313_v26 = vld [vmem:[%s1660_s0 + $0x60] sm:$0xff]   ;;  %v1314_v27 = vld [vmem:[%s1660_s0 + $0x68] sm:$0xff]  }
   0xa   :  { %v1315_v28 = vld [vmem:[%s1660_s0 + $0x70] sm:$0xff]   ;;  %v1317_v29 = vld [vmem:[%s1660_s0 + $0x78] sm:$0xff]   ;;  %v1320_v30 = vld [vmem:[%s1660_s0 + $0x80] sm:$0xff]  }
   0xb   :  { %1150 = vmatpush3.bf16.msra.mxu0 %v374_v4  ;;  %1292 = vmatpush3.bf16.msra.mxu1 %v374_v4  ;;  %v1322_v31 = vld [vmem:[%s1660_s0 + $0x88] sm:$0xff]   ;;  %v1324_v32 = vld [vmem:[%s1660_s0 + $0x90] sm:$0xff]   ;;  %v1326_v33 = vld [vmem:[%s1660_s0 + $0x98] sm:$0xff]  }
   0xc   :  { %v1328_v34 = vld [vmem:[%s1660_s0 + $0xa0] sm:$0xff]   ;;  %v1330_v35 = vld [vmem:[%s1660_s0 + $0xa8] sm:$0xff]  }
   0xd   :  { %v729_v42 = vld [vmem:[%s1661_s3] sm:$0xff] }
   0xe   :  { %1152 = vmatmul.mubr.msk.bf16.vlgmr.msra.gmra.mrb[0].mxu0 %vm275_vm0, %v1302_v5  ;;  %1196 = vmatmul.mubr.msk.bf16.vlgmr.msra.gmra.mrb[0].mxu1 %vm275_vm0, %v1318_v10  ;;  %v1514_v43 = vrot.slane %v729_v42, %v737_v41  ;;  %v731_v45 = vcombine.high %v729_v42, %v729_v42  ;;  %v1523_v47 = vld [vmem:[%s1662_s2] ss:$0 sm:$0xff] }
   0xf   :  { %1155 = vmatprep.mubr.msk.bf16.mxu0 %vm275_vm0, %v1303_v6  ;;  %1199 = vmatprep.mubr.msk.bf16.mxu1 %vm275_vm0, %v1319_v11 }
  0x10   :  { %v746_v44 = vcombine.high %v1514_v43, %v1514_v43  ;;  %v1518_v46 = vrot.slane %v731_v45, %v737_v41 }
  0x16   :  { %1156 = vmatmul.mubr.msk.bf16.gmra.mrb[4].mxu0 %vm275_vm0, %v1304_v7  ;;  %1200 = vmatmul.mubr.msk.bf16.gmra.mrb[4].mxu1 %vm275_vm0, %v1321_v14 }
  0x17   :  { %1159 = vmatprep.mubr.msk.bf16.mxu0 %vm275_vm0, %v1305_v9  ;;  %1203 = vmatprep.mubr.msk.bf16.mxu1 %vm275_vm0, %v1323_v15 }
  0x1e   :  { %1160 = vmatmul.mubr.msk.bf16.gmra.mrb[8].mxu0 %vm275_vm0, %v1306_v12  ;;  %1204 = vmatmul.mubr.msk.bf16.gmra.mrb[8].mxu1 %vm275_vm0, %v1325_v17 }
  0x1f   :  { %1163 = vmatprep.mubr.msk.bf16.mxu0 %vm275_vm0, %v1307_v13  ;;  %1207 = vmatprep.mubr.msk.bf16.mxu1 %vm275_vm0, %v1327_v19 }
  0x26   :  { %1164 = vmatmul.mubr.msk.bf16.gmra.mrb[12].mxu0 %vm275_vm0, %v1308_v16  ;;  %1208 = vmatmul.mubr.msk.bf16.gmra.mrb[12].mxu1 %vm275_vm0, %v1329_v21 }
  0x27   :  { %1167 = vmatprep.mubr.msk.bf16.mxu0 %vm275_vm0, %v1309_v18  ;;  %1211 = vmatprep.mubr.msk.bf16.mxu1 %vm275_vm0, %v1331_v23 }
  0x2e   :  { %1168 = vmatmul.mubr.msk.bf16.gmra.mrb[16].mxu0 %vm275_vm0, %v1310_v20  ;;  %1212 = vmatmul.mubr.msk.bf16.gmra.mrb[16].mxu1 %vm275_vm0, %v1332_v25 }
  0x2f   :  { %1171 = vmatprep.mubr.msk.bf16.mxu0 %vm275_vm0, %v1311_v22  ;;  %816 = vmatprep.mubr.f32.mxu1 %v746_v44 }
  0x36   :  { %1172 = vmatmul.mubr.msk.bf16.gmra.mrb[20].mxu0 %vm275_vm0, %v1312_v24 }
  0x37   :  { %1175 = vmatprep.mubr.msk.bf16.mxu0 %vm275_vm0, %v1313_v26 }
  0x3e   :  { %1176 = vmatmul.mubr.msk.bf16.gmra.mrb[24].mxu0 %vm275_vm0, %v1314_v27 }
  0x3f   :  { %1179 = vmatprep.mubr.msk.bf16.mxu0 %vm275_vm0, %v1315_v28 }
  0x46   :  { %1180 = vmatmul.mubr.msk.bf16.gmra.mrb[28].mxu0 %vm275_vm0, %v1317_v29 }
  0x47   :  { %1183 = vmatprep.mubr.msk.bf16.mxu0 %vm275_vm0, %v1320_v30 }
  0x4e   :  { %1184 = vmatmul.mubr.msk.bf16.gmra.mrb[32].mxu0 %vm275_vm0, %v1322_v31 }
  0x4f   :  { %1187 = vmatprep.mubr.msk.bf16.mxu0 %vm275_vm0, %v1324_v32 }
  0x56   :  { %1188 = vmatmul.mubr.msk.bf16.gmra.mrb[36].mxu0 %vm275_vm0, %v1326_v33 }
  0x57   :  { %1191 = vmatprep.mubr.msk.bf16.mxu0 %vm275_vm0, %v1328_v34 }
  0x5e   :  { %1192 = vmatmul.mubr.msk.bf16.gmra.mrb[40].mxu0 %vm275_vm0, %v1330_v35 }
  0xe1   :  { %v1153_v48 = vpop.f32.mrb[0].mxu0  ;;  %v1197_v63 = vpop.f32.mrb[0].mxu1 }
  0xe2   :  { %v419_v49 = vadd.f32 %v1153_v48, %v1523_v47  ;;  %v410_v50 = vpop.f32.mrb[1].mxu0  ;;  %v595_v2 = vadd.f32 %v1197_v63, %v1523_v47  ;;  %v586_v3 = vpop.f32.mrb[1].mxu1 }
  0xe3   :  { %v411_v51 = vadd.f32 %v1523_v47, %v410_v50  ;;  %v1154_v52 = vpop.f32.mrb[2].mxu0  ;;  %v587_v6 = vadd.f32 %v1523_v47, %v586_v3  ;;  %v1198_v7 = vpop.f32.mrb[2].mxu1 }
  0xe4   :  { %v422_v53 = vadd.f32 %v1154_v52, %v1523_v47  ;;  %v413_v54 = vpop.f32.mrb[3].mxu0  ;;  %v667_v56 = vmax.f32 %v419_v49, 0.0  ;;  %v711_v10 = vmax.f32 %v595_v2, 0.0  ;;  %v598_v11 = vadd.f32 %v1198_v7, %v1523_v47  ;;  %v589_v12 = vpop.f32.mrb[3].mxu1 }
  0xe5   :  { %v414_v55 = vadd.f32 %v1523_v47, %v413_v54  ;;  %v665_v58 = vmax.f32 %v411_v51, 0.0  ;;  %v709_v14 = vmax.f32 %v587_v6, 0.0  ;;  %v590_v15 = vadd.f32 %v1523_v47, %v589_v12 }
  0xe6   :  { %v668_v57 = vmax.f32 %v422_v53, 0.0  ;;  %v712_v18 = vmax.f32 %v598_v11, 0.0 }
  0xe7   :  { %v666_v59 = vmax.f32 %v414_v55, 0.0  ;;  %v710_v21 = vmax.f32 %v590_v15, 0.0 }
  0xe8   :  { %v1529_v60 = vpack.c.bf16 %v668_v57, %v667_v56  ;;  %v1543_v23 = vpack.c.bf16 %v712_v18, %v711_v10 }
  0xe9   :  { %v1531_v61 = vpack.c.bf16 %v666_v59, %v665_v58  ;;  %v1157_v62 = vpop.f32.mrb[4].mxu0  ;;  %v1547_v26 = vpack.c.bf16 %v710_v21, %v709_v14  ;;  %v1201_v27 = vpop.f32.mrb[4].mxu1 }
  0xea   :  { %v435_v0 = vadd.f32 %v1157_v62, %v1523_v47  ;;  %v426_v1 = vpop.f32.mrb[5].mxu0  ;;  %v611_v30 = vadd.f32 %v1201_v27, %v1523_v47  ;;  %v602_v31 = vpop.f32.mrb[5].mxu1 }
  0xeb   :  { %v427_v4 = vadd.f32 %v1523_v47, %v426_v1  ;;  %v1158_v5 = vpop.f32.mrb[6].mxu0  ;;  %v603_v34 = vadd.f32 %v1523_v47, %v602_v31  ;;  %v1202_v35 = vpop.f32.mrb[6].mxu1 }
  0xec   :  { %v438_v8 = vadd.f32 %v1158_v5, %v1523_v47  ;;  %v429_v9 = vpop.f32.mrb[7].mxu0  ;;  %v671_v16 = vmax.f32 %v435_v0, 0.0  ;;  %v715_v38 = vmax.f32 %v611_v30, 0.0  ;;  %v614_v39 = vadd.f32 %v1202_v35, %v1523_v47  ;;  %v605_v40 = vpop.f32.mrb[7].mxu1 }
  0xed   :  { %v430_v13 = vadd.f32 %v1523_v47, %v429_v9  ;;  %v669_v19 = vmax.f32 %v427_v4, 0.0  ;;  %v713_v42 = vmax.f32 %v603_v34, 0.0  ;;  %v606_v44 = vadd.f32 %v1523_v47, %v605_v40 }
  0xee   :  { %v672_v17 = vmax.f32 %v438_v8, 0.0  ;;  %v716_v49 = vmax.f32 %v614_v39, 0.0 }
  0xef   :  { %v670_v20 = vmax.f32 %v430_v13, 0.0  ;;  %v714_v52 = vmax.f32 %v606_v44, 0.0 }
  0xf0   :  { %v1541_v22 = vpack.c.bf16 %v672_v17, %v671_v16  ;;  %v1559_v54 = vpack.c.bf16 %v716_v49, %v715_v38 }
  0xf1   :  { %v1545_v24 = vpack.c.bf16 %v670_v20, %v669_v19  ;;  %v1161_v25 = vpop.f32.mrb[8].mxu0  ;;  %v1563_v57 = vpack.c.bf16 %v714_v52, %v713_v42  ;;  %v1205_v58 = vpop.f32.mrb[8].mxu1 }
  0xf2   :  { %v451_v28 = vadd.f32 %v1161_v25, %v1523_v47  ;;  %v442_v29 = vpop.f32.mrb[9].mxu0  ;;  %v627_v63 = vadd.f32 %v1205_v58, %v1523_v47  ;;  %v618_v0 = vpop.f32.mrb[9].mxu1 }
  0xf3   :  { %v443_v32 = vadd.f32 %v1523_v47, %v442_v29  ;;  %v1162_v33 = vpop.f32.mrb[10].mxu0  ;;  %v619_v3 = vadd.f32 %v1523_v47, %v618_v0  ;;  %v1206_v4 = vpop.f32.mrb[10].mxu1 }
  0xf4   :  { %v454_v36 = vadd.f32 %v1162_v33, %v1523_v47  ;;  %v445_v37 = vpop.f32.mrb[11].mxu0  ;;  %v675_v45 = vmax.f32 %v451_v28, 0.0  ;;  %v719_v7 = vmax.f32 %v627_v63, 0.0  ;;  %v630_v8 = vadd.f32 %v1206_v4, %v1523_v47  ;;  %v621_v9 = vpop.f32.mrb[11].mxu1 }
  0xf5   :  { %v446_v41 = vadd.f32 %v1523_v47, %v445_v37  ;;  %v673_v50 = vmax.f32 %v443_v32, 0.0  ;;  %v717_v11 = vmax.f32 %v619_v3, 0.0  ;;  %v622_v12 = vadd.f32 %v1523_v47, %v621_v9 }
  0xf6   :  { %v676_v48 = vmax.f32 %v454_v36, 0.0  ;;  %v720_v15 = vmax.f32 %v630_v8, 0.0 }
  0xf7   :  { %v674_v51 = vmax.f32 %v446_v41, 0.0  ;;  %v718_v18 = vmax.f32 %v622_v12, 0.0 }
  0xf8   :  { %v1557_v53 = vpack.c.bf16 %v676_v48, %v675_v45  ;;  %v1575_v20 = vpack.c.bf16 %v720_v15, %v719_v7 }
  0xf9   :  { %v1561_v55 = vpack.c.bf16 %v674_v51, %v673_v50  ;;  %v1165_v56 = vpop.f32.mrb[12].mxu0  ;;  %v1579_v27 = vpack.c.bf16 %v718_v18, %v717_v11  ;;  %v1209_v28 = vpop.f32.mrb[12].mxu1 }
  0xfa   :  { %v467_v59 = vadd.f32 %v1165_v56, %v1523_v47  ;;  %v458_v62 = vpop.f32.mrb[13].mxu0  ;;  %v643_v31 = vadd.f32 %v1209_v28, %v1523_v47  ;;  %v634_v32 = vpop.f32.mrb[13].mxu1 }
  0xfb   :  { %v459_v1 = vadd.f32 %v1523_v47, %v458_v62  ;;  %v1166_v2 = vpop.f32.mrb[14].mxu0  ;;  %v635_v35 = vadd.f32 %v1523_v47, %v634_v32  ;;  %v1210_v36 = vpop.f32.mrb[14].mxu1 }
  0xfc   :  { %v470_v5 = vadd.f32 %v1166_v2, %v1523_v47  ;;  %v461_v6 = vpop.f32.mrb[15].mxu0  ;;  %v679_v13 = vmax.f32 %v467_v59, 0.0  ;;  %v723_v39 = vmax.f32 %v643_v31, 0.0  ;;  %v646_v40 = vadd.f32 %v1210_v36, %v1523_v47  ;;  %v637_v41 = vpop.f32.mrb[15].mxu1 }
  0xfd   :  { %v462_v10 = vadd.f32 %v1523_v47, %v461_v6  ;;  %v677_v16 = vmax.f32 %v459_v1, 0.0  ;;  %v721_v44 = vmax.f32 %v635_v35, 0.0  ;;  %v638_v45 = vadd.f32 %v1523_v47, %v637_v41 }
  0xfe   :  { %v680_v14 = vmax.f32 %v470_v5, 0.0  ;;  %v724_v50 = vmax.f32 %v646_v40, 0.0 }
  0xff   :  { %v678_v17 = vmax.f32 %v462_v10, 0.0  ;;  %v722_v56 = vmax.f32 %v638_v45, 0.0 }
 0x100   :  { %v1573_v19 = vpack.c.bf16 %v680_v14, %v679_v13  ;;  %v1589_v59 = vpack.c.bf16 %v724_v50, %v723_v39 }
 0x101   :  { %v1577_v21 = vpack.c.bf16 %v678_v17, %v677_v16  ;;  %v1169_v25 = vpop.f32.mrb[16].mxu0  ;;  %v1591_v0 = vpack.c.bf16 %v722_v56, %v721_v44  ;;  %v1213_v1 = vpop.f32.mrb[16].mxu1 }
 0x102   :  { %v483_v29 = vadd.f32 %v1169_v25, %v1523_v47  ;;  %v474_v30 = vpop.f32.mrb[17].mxu0  ;;  %v659_v4 = vadd.f32 %v1213_v1, %v1523_v47  ;;  %v650_v5 = vpop.f32.mrb[17].mxu1 }
 0x103   :  { %v475_v33 = vadd.f32 %v1523_v47, %v474_v30  ;;  %v1170_v34 = vpop.f32.mrb[18].mxu0  ;;  %v651_v8 = vadd.f32 %v1523_v47, %v650_v5  ;;  %v1214_v9 = vpop.f32.mrb[18].mxu1 }
 0x104   :  { %v486_v37 = vadd.f32 %v1170_v34, %v1523_v47  ;;  %v477_v38 = vpop.f32.mrb[19].mxu0  ;;  %v683_v48 = vmax.f32 %v483_v29, 0.0  ;;  %v727_v12 = vmax.f32 %v659_v4, 0.0  ;;  %v662_v13 = vadd.f32 %v1214_v9, %v1523_v47  ;;  %v653_v14 = vpop.f32.mrb[19].mxu1 }
 0x105   :  { %v478_v42 = vadd.f32 %v1523_v47, %v477_v38  ;;  %v681_v51 = vmax.f32 %v475_v33, 0.0  ;;  %v725_v16 = vmax.f32 %v651_v8, 0.0  ;;  %v654_v17 = vadd.f32 %v1523_v47, %v653_v14 }
 0x106   :  { %v684_v49 = vmax.f32 %v486_v37, 0.0  ;;  %v728_v28 = vmax.f32 %v662_v13, 0.0 }
 0x107   :  { %v682_v52 = vmax.f32 %v478_v42, 0.0  ;;  %v726_v31 = vmax.f32 %v654_v17, 0.0 }
 0x108   :  { %v1227_v58 = vpack.c.bf16 %v684_v49, %v683_v48 }
 0x109   :  { %v1223_v62 = vpack.c.bf16 %v682_v52, %v681_v51  ;;  %v1173_v63 = vpop.f32.mrb[20].mxu0  ;;  %v1605_v35 = vpack.c.bf16 %v726_v31, %v725_v16 }
 0x10a   :  { %v499_v2 = vadd.f32 %v1173_v63, %v1523_v47  ;;  %v490_v3 = vpop.f32.mrb[21].mxu0 }
 0x10b   :  { %v491_v6 = vadd.f32 %v1523_v47, %v490_v3  ;;  %v1174_v7 = vpop.f32.mrb[22].mxu0  ;;  %1224 = vmatprep.subr.bf16.mxu1 %v1223_v62 }
 0x10c   :  { %v502_v10 = vadd.f32 %v1174_v7, %v1523_v47  ;;  %v493_v11 = vpop.f32.mrb[23].mxu0  ;;  %1226 = vmatpush3.bf16.msra.mxu1 %v1531_v61  ;;  %v687_v18 = vmax.f32 %v499_v2, 0.0  ;;  %v1603_v61 = vpack.c.bf16 %v728_v28, %v727_v12 }
 0x10d   :  { %v494_v15 = vadd.f32 %v1523_v47, %v493_v11  ;;  %1228 = vmatprep.subr.bf16.mxu1 %v1227_v58  ;;  %v685_v29 = vmax.f32 %v491_v6, 0.0 }
 0x10e   :  { %v688_v25 = vmax.f32 %v502_v10, 0.0 }
 0x10f   :  { %v686_v30 = vmax.f32 %v494_v15, 0.0 }
 0x110   :  { %v1235_v32 = vpack.c.bf16 %v688_v25, %v687_v18  ;;  %1230 = vmatpush3.bf16.msra.mxu1 %v1529_v60  ;;  %v747_v18 = vcombine.high %v1518_v46, %v1518_v46 }
 0x111   :  { %v1231_v33 = vpack.c.bf16 %v686_v30, %v685_v29  ;;  %v1177_v34 = vpop.f32.mrb[24].mxu0 }
 0x112   :  { %v515_v36 = vadd.f32 %v1177_v34, %v1523_v47  ;;  %v506_v37 = vpop.f32.mrb[25].mxu0 }
 0x113   :  { %v507_v38 = vadd.f32 %v1523_v47, %v506_v37  ;;  %v1178_v39 = vpop.f32.mrb[26].mxu0  ;;  %1232 = vmatprep.subr.bf16.mxu1 %v1231_v33 }
 0x114   :  { %v518_v40 = vadd.f32 %v1178_v39, %v1523_v47  ;;  %v509_v41 = vpop.f32.mrb[27].mxu0  ;;  %1234 = vmatpush3.bf16.msra.mxu1 %v1545_v24  ;;  %v691_v42 = vmax.f32 %v515_v36, 0.0 }
 0x115   :  { %v510_v60 = vadd.f32 %v1523_v47, %v509_v41  ;;  %1236 = vmatprep.subr.bf16.mxu1 %v1235_v32  ;;  %v689_v45 = vmax.f32 %v507_v38, 0.0 }
 0x116   :  { %v692_v44 = vmax.f32 %v518_v40, 0.0 }
 0x117   :  { %v690_v48 = vmax.f32 %v510_v60, 0.0 }
 0x118   :  { %v1243_v49 = vpack.c.bf16 %v692_v44, %v691_v42  ;;  %1238 = vmatpush3.bf16.msra.mxu1 %v1541_v22 }
 0x119   :  { %v1239_v50 = vpack.c.bf16 %v690_v48, %v689_v45  ;;  %v1181_v51 = vpop.f32.mrb[28].mxu0 }
 0x11a   :  { %v531_v52 = vadd.f32 %v1181_v51, %v1523_v47  ;;  %v522_v56 = vpop.f32.mrb[29].mxu0 }
 0x11b   :  { %v523_v58 = vadd.f32 %v1523_v47, %v522_v56  ;;  %v1182_v62 = vpop.f32.mrb[30].mxu0  ;;  %1240 = vmatprep.subr.bf16.mxu1 %v1239_v50 }
 0x11c   :  { %v534_v24 = vadd.f32 %v1182_v62, %v1523_v47  ;;  %v525_v63 = vpop.f32.mrb[31].mxu0  ;;  %1242 = vmatpush3.bf16.msra.mxu1 %v1561_v55  ;;  %v695_v2 = vmax.f32 %v531_v52, 0.0  ;;  %v1033_v62 = vld [vmem:[%s1664_s5] ss:$0 sm:$0xff] }
 0x11d   :  { %v526_v1 = vadd.f32 %v1523_v47, %v525_v63  ;;  %1244 = vmatprep.subr.bf16.mxu1 %v1243_v49  ;;  %v693_v22 = vmax.f32 %v523_v58, 0.0 }
 0x11e   :  { %v696_v3 = vmax.f32 %v534_v24, 0.0 }
 0x11f   :  { %v694_v4 = vmax.f32 %v526_v1, 0.0 }
 0x120   :  { %v1251_v5 = vpack.c.bf16 %v696_v3, %v695_v2  ;;  %1246 = vmatpush3.bf16.msra.mxu1 %v1557_v53 }
 0x121   :  { %v1247_v6 = vpack.c.bf16 %v694_v4, %v693_v22  ;;  %v1185_v7 = vpop.f32.mrb[32].mxu0 }
 0x122   :  { %v547_v8 = vadd.f32 %v1185_v7, %v1523_v47  ;;  %v538_v9 = vpop.f32.mrb[33].mxu0 }
 0x123   :  { %v539_v10 = vadd.f32 %v1523_v47, %v538_v9  ;;  %1248 = vmatprep.subr.bf16.mxu1 %v1247_v6  ;;  %v1186_v11 = vpop.f32.mrb[34].mxu0 }
 0x124   :  { %v699_v55 = vmax.f32 %v547_v8, 0.0  ;;  %v550_v12 = vadd.f32 %v1186_v11, %v1523_v47  ;;  %1250 = vmatpush3.bf16.msra.mxu1 %v1577_v21  ;;  %v541_v13 = vpop.f32.mrb[35].mxu0 }
 0x125   :  { %v542_v14 = vadd.f32 %v1523_v47, %v541_v13  ;;  %1252 = vmatprep.subr.bf16.mxu1 %v1251_v5  ;;  %v697_v53 = vmax.f32 %v539_v10, 0.0 }
 0x126   :  { %v700_v15 = vmax.f32 %v550_v12, 0.0 }
 0x127   :  { %v698_v16 = vmax.f32 %v542_v14, 0.0 }
 0x128   :  { %v1261_v17 = vpack.c.bf16 %v700_v15, %v699_v55  ;;  %1254 = vmatpush3.bf16.msra.mxu1 %v1573_v19 }
 0x129   :  { %v1257_v25 = vpack.c.bf16 %v698_v16, %v697_v53  ;;  %v1189_v28 = vpop.f32.mrb[36].mxu0  ;;  %1256 = vmatprep.subr.bf16.mxu1 %v1563_v57 }
 0x12a   :  { %v563_v29 = vadd.f32 %v1189_v28, %v1523_v47  ;;  %v554_v21 = vpop.f32.mrb[37].mxu0 }
 0x12b   :  { %v555_v30 = vadd.f32 %v1523_v47, %v554_v21  ;;  %v1190_v31 = vpop.f32.mrb[38].mxu0  ;;  %817 = vmatmul.mubr.f32.vlgmr.msra.gmra.mrb[20].mxu1 %v1514_v43 }
 0x12c   :  { %v703_v32 = vmax.f32 %v563_v29, 0.0  ;;  %v566_v33 = vadd.f32 %v1190_v31, %v1523_v47  ;;  %1258 = vmatpush3.bf16.msra.mxu1 %v1257_v25  ;;  %v557_v19 = vpop.f32.mrb[39].mxu0  ;;  %886 = vmatprep.mubr.f32.mxu1 %v747_v18 }
 0x12d   :  { %v558_v34 = vadd.f32 %v1523_v47, %v557_v19  ;;  %1260 = vmatprep.subr.bf16.mxu1 %v1559_v54  ;;  %v701_v57 = vmax.f32 %v555_v30, 0.0 }
 0x12e   :  { %v704_v36 = vmax.f32 %v566_v33, 0.0 }
 0x12f   :  { %v702_v37 = vmax.f32 %v558_v34, 0.0 }
 0x130   :  { %v1269_v38 = vpack.c.bf16 %v704_v36, %v703_v32  ;;  %1262 = vmatpush3.bf16.msra.mxu1 %v1261_v17 }
 0x131   :  { %v1265_v39 = vpack.c.bf16 %v702_v37, %v701_v57  ;;  %v1193_v40 = vpop.f32.mrb[40].mxu0  ;;  %1264 = vmatprep.subr.bf16.mxu1 %v1579_v27 }
 0x132   :  { %v579_v43 = vadd.f32 %v1193_v40, %v1523_v47  ;;  %v570_v41 = vpop.f32.mrb[41].mxu0 }
 0x133   :  { %v571_v60 = vadd.f32 %v1523_v47, %v570_v41  ;;  %v1194_v42 = vpop.f32.mrb[42].mxu0 }
 0x134   :  { %v707_v44 = vmax.f32 %v579_v43, 0.0  ;;  %v582_v45 = vadd.f32 %v1194_v42, %v1523_v47  ;;  %1266 = vmatpush3.bf16.msra.mxu1 %v1265_v39  ;;  %v573_v54 = vpop.f32.mrb[43].mxu0 }
 0x135   :  { %v574_v48 = vadd.f32 %v1523_v47, %v573_v54  ;;  %1268 = vmatprep.subr.bf16.mxu1 %v1575_v20  ;;  %v705_v50 = vmax.f32 %v571_v60, 0.0  ;;  %v1334_v47 = vld [vmem:[%s1663_s4] sm:$0xff]   ;;  %v1337_v20 = vmov 0.0  }
 0x136   :  { %v708_v49 = vmax.f32 %v582_v45, 0.0 }
 0x137   :  { %v706_v51 = vmax.f32 %v574_v48, 0.0 }
 0x138   :  { %v1277_v52 = vpack.c.bf16 %v708_v49, %v707_v44  ;;  %1270 = vmatpush3.bf16.msra.mxu1 %v1269_v38 }
 0x139   :  { %v1273_v27 = vpack.c.bf16 %v706_v51, %v705_v50  ;;  %1272 = vmatprep.subr.bf16.mxu1 %v1591_v0 }
 0x13c   :  { %1274 = vmatpush3.bf16.msra.mxu1 %v1273_v27 }
 0x13d   :  { %1276 = vmatprep.subr.bf16.mxu1 %v1589_v59  ;;  %v1335_v59 = vld [vmem:[%s1663_s4 + $0x8] sm:$0xff]  }
 0x140   :  { %1278 = vmatpush3.bf16.msra.mxu1 %v1277_v52 }
 0x141   :  { %1280 = vmatprep.subr.bf16.mxu1 %v1605_v35 }
 0x144   :  { %1282 = vmatpush3.bf16.msra.mxu1 %v1547_v26 }
 0x145   :  { %1284 = vmatprep.subr.bf16.mxu1 %v1603_v61 }
 0x148   :  { %1286 = vmatpush3.bf16.msra.mxu1 %v1543_v23 }
 0x149   :  { %1215 = vmatprep.subr.bf16.mxu1 %v1337_v20 }
 0x14b   :  { %887 = vmatmul.mubr.f32.vlgmr.msra.gmra.mrb[22].mxu1 %v1518_v46 }
 0x14c   :  { %1216 = vmatpush3.bf16.msra.mxu1 %v1334_v47  ;;  %1219 = vmatprep.mubr.msk.bf16.mxu1 %vm1338_vm2, %v1337_v20 }
 0x14d   :  { %1217 = vmatprep.subr.bf16.mxu1 %v1337_v20 }
 0x150   :  { %1218 = vmatpush3.bf16.msra.mxu1 %v1335_v59 }
 0x1fe   :  { %v1104_v26 = vpop.f32.mrb[20].mxu1 }
 0x1ff   :  { %v1105_v0 = vpop.f32.mrb[21].mxu1 }
 0x200   :  { %v1106_v23 = vadd.f32 %v1105_v0, %v1104_v26 }
 0x21e   :  { %v1139_v61 = vpop.f32.mrb[22].mxu1 }
 0x21f   :  { %v1140_v46 = vpop.f32.mrb[23].mxu1 }
 0x220   :  { %v1141_v35 = vadd.f32 %v1140_v46, %v1139_v61 }
 0x222   :  { %v889_v56 = vadd.f32 %v1141_v35, %v1106_v23 }
 0x224   :  { %v892_v58 = vpack.c.bf16 %v889_v56, %v889_v56 }
 0x226   :  { %1220 = vmatmul.mubr.msk.bf16.vlgmr.msra.gmra.mrb[24].mxu1 %vm916_vm3, %v892_v58 }
 0x2f9   :  { %v954_v24 = vpop.f32.mrb[24].mxu1 }
 0x2fa   :  { %v955_v63 = vadd.f32 %v1033_v62, %v954_v24  ;;  %v1221_v1 = vpop.f32.mrb[25].mxu1 }
 0x2fb   :  { %v957_v2 = vpop.f32.mrb[26].mxu1 }
 0x2fc   :  { %960 = vst [vmem:[%s1665_s6] sm:$0x3] %v955_v63  ;;  %v1222_v3 = vpop.f32.mrb[27].mxu1 }

</bundles_post_ra>
